<compile_context>
chip_gen: v7x
topology: tpu7x:2x2x1
jax: 0.10.0
libtpu: 0.0.40
codegen_flags: <defaults>
</compile_context>

<pallas_src>
import functools

import jax
import jax.numpy as jnp
from jax.experimental import pallas as pl
from jax.experimental.pallas import tpu as pltpu

LANES = 128
SUBLANES = 8


def _is_v7x():
    """Best-effort detection of a 2-TensorCore (v7x-class) chip."""
    try:
        kind = jax.devices()[0].device_kind.lower()
        return "v7" in kind
    except Exception:
        return False


def _dice_kernel(out_ref, tgt_ref, partial_ref, acc_ref, *,
                 row_tile, tiles_per_split, total_rows, full_tiles, use_mask):
    c = pl.program_id(0)          # parallel split (megacore on v7x)
    j = pl.program_id(1)          # sequential reduction over row tiles

    @pl.when(j == 0)
    def _():
        acc_ref[...] = jnp.zeros_like(acc_ref)

    def fold(v):
        # (row_tile, 128) -> (8, 128): the reshape preserves the native
        # (8,128) tiling, so the sum over the leading axis is plain VPU vreg
        # adds (no XLU cross-lane work in the hot loop).
        return v.reshape(row_tile // SUBLANES, SUBLANES, LANES).sum(axis=0)

    def accumulate(masked):
        x = out_ref[...].astype(jnp.float32)
        t = tgt_ref[...].astype(jnp.float32)
        # sigmoid(x) = 0.5*tanh(x/2) + 0.5: one EUP transcendental per element.
        sig = 0.5 * jnp.tanh(0.5 * x) + 0.5
        prod = sig * t            # -> sum(sigmoid(out) * tgt)
        den = sig + t             # -> sum(sigmoid(out)) + sum(tgt), combined
        if masked:
            # Cold path only: ragged last tile and/or clamped duplicate
            # blocks.  Full tiles never execute this branch.
            tile_idx = c * tiles_per_split + j
            valid_rows = total_rows - tile_idx * row_tile
            row_ids = jax.lax.broadcasted_iota(jnp.int32, (row_tile, LANES), 0)
            keep = row_ids < valid_rows
            prod = jnp.where(keep, prod, 0.0)
            den = jnp.where(keep, den, 0.0)
        acc_ref[0] += fold(prod)
        acc_ref[1] += fold(den)

    if use_mask:
        tile_idx = c * tiles_per_split + j

        @pl.when(tile_idx < full_tiles)
        def _():
            accumulate(masked=False)

        @pl.when(tile_idx >= full_tiles)
        def _():
            accumulate(masked=True)
    else:
        accumulate(masked=False)

    @pl.when(j == pl.num_programs(1) - 1)
    def _():
        partial_ref[0] = acc_ref[...]


def dice_with_logits_loss(output, target, smooth=0.0, eps=1e-07):
    """Pallas equivalent of DiceWithLogitsLoss.forward(output, target)."""
    assert output.shape == target.shape

    n = int(output.size)
    out_flat = output.reshape(-1)
    tgt_flat = target.reshape(-1)

    smooth = jnp.float32(smooth)
    eps = jnp.float32(eps)

    chunk = SUBLANES * LANES                 # 1024
    rows = (n // chunk) * SUBLANES           # kernel rows (multiple of 8)
    n_main = rows * LANES                    # kernel prefix (multiple of 1024)

    if rows == 0:
        # Tiny input: pure jnp.
        sig = jax.nn.sigmoid(out_flat.astype(jnp.float32))
        t = tgt_flat.astype(jnp.float32)
        return jnp.float32(1.0) - (2.0 * jnp.sum(sig * t) + smooth) / (
            jnp.sum(sig) + jnp.sum(t) + smooth + eps)

    is_v7x = _is_v7x()

    # Lane-dense 2-D slab.  When n % 128 == 0 the reshape is a free bitcast of
    # the whole array (no pad, no copy); the kernel simply never indexes past
    # `rows`.  Only when n % 128 != 0 do we materialize the aligned prefix.
    if n % LANES == 0:
        out2d = out_flat.reshape(n // LANES, LANES)
        tgt2d = tgt_flat.reshape(n // LANES, LANES)
    else:
        # TODO(synk): a manual-DMA (pl.ANY) variant could stream the unaligned
        # prefix without this one-time copy.
        out2d = jax.lax.slice(out_flat, (0,), (n_main,)).reshape(rows, LANES)
        tgt2d = jax.lax.slice(tgt_flat, (0,), (n_main,)).reshape(rows, LANES)

    # Tile size: ~2 MiB per input block (4 MiB on v7x, where HBM per step is
    # otherwise faster than the fixed per-step overhead), dtype-aware so bf16
    # gets twice the rows for the same bytes.
    block_bytes = (4 if is_v7x else 2) * 1024 * 1024
    itemsize = max(output.dtype.itemsize, target.dtype.itemsize)
    row_cap = max(SUBLANES,
                  (block_bytes // (LANES * itemsize)) // SUBLANES * SUBLANES)
    row_tile = min(row_cap, rows)

    total_tiles = -(-rows // row_tile)
    full_tiles = rows // row_tile            # tiles fully covered by `rows`

    # Megacore split only where a second TensorCore exists (v7x).
    n_splits = 2 if (is_v7x and total_tiles >= 2) else 1
    tiles_per_split = -(-total_tiles // n_splits)

    need_clamp = n_splits * tiles_per_split != total_tiles
    use_mask = need_clamp or (full_tiles != total_tiles)

    if need_clamp:
        last_tile = total_tiles - 1

        def in_map(c, j):
            # Clamp fully out-of-range blocks onto the last valid tile; the
            # cold-path mask (on the unclamped logical index) zeroes them.
            return (jnp.minimum(c * tiles_per_split + j, last_tile), 0)
    else:
        def in_map(c, j):
            return (c * tiles_per_split + j, 0)

    kernel = functools.partial(
        _dice_kernel,
        row_tile=row_tile,
        tiles_per_split=tiles_per_split,
        total_rows=rows,
        full_tiles=full_tiles,
        use_mask=use_mask,
    )

    partials = pl.pallas_call(
        kernel,
        out_shape=jax.ShapeDtypeStruct((n_splits, 2, SUBLANES, LANES),
                                       jnp.float32),
        grid_spec=pltpu.PrefetchScalarGridSpec(
            num_scalar_prefetch=0,
            grid=(n_splits, tiles_per_split),
            in_specs=[
                pl.BlockSpec((row_tile, LANES), in_map),
                pl.BlockSpec((row_tile, LANES), in_map),
            ],
            out_specs=pl.BlockSpec((1, 2, SUBLANES, LANES),
                                   lambda c, j: (c, 0, 0, 0)),
            scratch_shapes=[pltpu.VMEM((2, SUBLANES, LANES), jnp.float32)],
        ),
        compiler_params=pltpu.CompilerParams(
            dimension_semantics=("parallel", "arbitrary"),
            vmem_limit_bytes=(48 if is_v7x else 32) * 1024 * 1024,
        ),
    )(out2d, tgt2d)

    inter = jnp.sum(partials[:, 0])          # sum(sigmoid(out) * tgt)
    den = jnp.sum(partials[:, 1])            # sum(sigmoid(out)) + sum(tgt)

    # Sub-1024-element tail handled with a few plain jnp ops (no padding /
    # whole-array copy in the aligned case).
    if n_main != n:
        tail_o = jax.lax.slice(out_flat, (n_main,), (n,)).astype(jnp.float32)
        tail_t = jax.lax.slice(tgt_flat, (n_main,), (n,)).astype(jnp.float32)
        tail_sig = jax.nn.sigmoid(tail_o)
        inter = inter + jnp.sum(tail_sig * tail_t)
        den = den + jnp.sum(tail_sig) + jnp.sum(tail_t)

    return jnp.float32(1.0) - (2.0 * inter + smooth) / (den + smooth + eps)


def _reference(output, target, smooth=0.0, eps=1e-07):
    sig = jax.nn.sigmoid(output.astype(jnp.float32))
    tgt = target.astype(jnp.float32)
    return 1.0 - (2.0 * jnp.sum(sig * tgt) + smooth) / (
        jnp.sum(sig) + jnp.sum(tgt) + smooth + eps)


if __name__ == "__main__":
    key = jax.random.PRNGKey(0)
    k1, k2 = jax.random.split(key)

    # NCHW-like logits and binary target mask, small shapes.
    x_shape = (2, 4, 16, 16)
    output = jax.random.normal(k1, x_shape, dtype=jnp.float32)
    target = (jax.random.uniform(k2, x_shape) > 0.5).astype(jnp.float32)

    loss = dice_with_logits_loss(output, target, smooth=0.0, eps=1e-07)
    loss = jax.block_until_ready(loss)

    ref = _reference(output, target)
    assert jnp.allclose(loss, ref, atol=1e-5, rtol=1e-5), (loss, ref)

    print("KERNEL_OK")
</pallas_src>

<mosaic_0001>
module attributes {stable_mosaic.version = 11 : i64} {
  func.func @_dice_kernel(%arg0: i32, %arg1: i32, %arg2: memref<16x128xf32, #tpu.memory_space<vmem>>, %arg3: memref<16x128xf32, #tpu.memory_space<vmem>>, %arg4: memref<1x2x8x128xf32, #tpu.memory_space<vmem>>, %arg5: memref<2x8x128xf32, #tpu.memory_space<vmem>>) attributes {dimension_semantics = [#tpu.dimension_semantics<parallel>, #tpu.dimension_semantics<arbitrary>], iteration_bounds = array<i64: 1, 1>, scalar_prefetch = 0 : i64, scratch_operands = 1 : i64, tpu.core_type = #tpu.core_type<tc>, window_params = [{transform_indices = @transform_0, window_bounds = array<i64: 16, 128>}, {transform_indices = @transform_1, window_bounds = array<i64: 16, 128>}, {transform_indices = @transform_2, window_bounds = array<i64: 1, 2, 8, 128>}]} {
    %c0_i32 = arith.constant 0 : i32
    %0 = arith.cmpi eq, %arg1, %c0_i32 : i32
    %1 = arith.extui %0 : i1 to i32
    %c0_i32_0 = arith.constant 0 : i32
    %2 = arith.cmpi ne, %1, %c0_i32_0 : i32
    scf.if %2 {
      %cst_21 = arith.constant 0.000000e+00 : f32
      %33 = vector.broadcast %cst_21 : f32 to vector<2x8x128xf32>
      %c0_22 = arith.constant 0 : index
      %c0_23 = arith.constant 0 : index
      %c0_24 = arith.constant 0 : index
      %34 = vector.load %arg5[%c0_22, %c0_23, %c0_24] : memref<2x8x128xf32, #tpu.memory_space<vmem>>, vector<2x8x128xf32>
      tpu.vector_store %arg5[%c0_22, %c0_23, %c0_24], %33 {strides = array<i32>} : memref<2x8x128xf32, #tpu.memory_space<vmem>>, vector<2x8x128xf32>,
    } else {
    }
    %c0 = arith.constant 0 : index
    %c0_1 = arith.constant 0 : index
    %3 = vector.load %arg2[%c0, %c0_1] : memref<16x128xf32, #tpu.memory_space<vmem>>, vector<16x128xf32>
    %c0_2 = arith.constant 0 : index
    %c0_3 = arith.constant 0 : index
    %4 = vector.load %arg3[%c0_2, %c0_3] : memref<16x128xf32, #tpu.memory_space<vmem>>, vector<16x128xf32>
    %cst = arith.constant 5.000000e-01 : f32
    %5 = vector.broadcast %cst : f32 to vector<16x128xf32>
    %6 = arith.mulf %5, %3 : vector<16x128xf32>
    %7 = math.tanh %6 : vector<16x128xf32>
    %cst_4 = arith.constant 5.000000e-01 : f32
    %8 = vector.broadcast %cst_4 : f32 to vector<16x128xf32>
    %9 = arith.mulf %8, %7 : vector<16x128xf32>
    %cst_5 = arith.constant 5.000000e-01 : f32
    %10 = vector.broadcast %cst_5 : f32 to vector<16x128xf32>
    %11 = arith.addf %9, %10 : vector<16x128xf32>
    %12 = arith.mulf %11, %4 : vector<16x128xf32>
    %13 = arith.addf %11, %4 : vector<16x128xf32>
    %c0_6 = arith.constant 0 : index
    %c0_7 = arith.constant 0 : index
    %c0_8 = arith.constant 0 : index
    %14 = vector.load %arg5[%c0_6, %c0_7, %c0_8] : memref<2x8x128xf32, #tpu.memory_space<vmem>>, vector<1x8x128xf32>
    %15 = vector.shape_cast %14 : vector<1x8x128xf32> to vector<8x128xf32>
    %16 = vector.shape_cast %12 : vector<16x128xf32> to vector<2x8x128xf32>
    %cst_9 = arith.constant dense<0.000000e+00> : vector<8x128xf32>
    %17 = vector.multi_reduction <add>, %16, %cst_9 [0] : vector<2x8x128xf32> to vector<8x128xf32>
    %18 = arith.addf %15, %17 : vector<8x128xf32>
    %c0_10 = arith.constant 0 : index
    %c0_11 = arith.constant 0 : index
    %c0_12 = arith.constant 0 : index
    %19 = vector.load %arg5[%c0_10, %c0_11, %c0_12] : memref<2x8x128xf32, #tpu.memory_space<vmem>>, vector<1x8x128xf32>
    %20 = vector.shape_cast %19 : vector<1x8x128xf32> to vector<8x128xf32>
    %21 = vector.shape_cast %18 : vector<8x128xf32> to vector<1x8x128xf32>
    tpu.vector_store %arg5[%c0_10, %c0_11, %c0_12], %21 {strides = array<i32>} : memref<2x8x128xf32, #tpu.memory_space<vmem>>, vector<1x8x128xf32>,
    %c1 = arith.constant 1 : index
    %c0_13 = arith.constant 0 : index
    %c0_14 = arith.constant 0 : index
    %22 = vector.load %arg5[%c1, %c0_13, %c0_14] : memref<2x8x128xf32, #tpu.memory_space<vmem>>, vector<1x8x128xf32>
    %23 = vector.shape_cast %22 : vector<1x8x128xf32> to vector<8x128xf32>
    %24 = vector.shape_cast %13 : vector<16x128xf32> to vector<2x8x128xf32>
    %cst_15 = arith.constant dense<0.000000e+00> : vector<8x128xf32>
    %25 = vector.multi_reduction <add>, %24, %cst_15 [0] : vector<2x8x128xf32> to vector<8x128xf32>
    %26 = arith.addf %23, %25 : vector<8x128xf32>
    %c1_16 = arith.constant 1 : index
    %c0_17 = arith.constant 0 : index
    %c0_18 = arith.constant 0 : index
    %27 = vector.load %arg5[%c1_16, %c0_17, %c0_18] : memref<2x8x128xf32, #tpu.memory_space<vmem>>, vector<1x8x128xf32>
    %28 = vector.shape_cast %27 : vector<1x8x128xf32> to vector<8x128xf32>
    %29 = vector.shape_cast %26 : vector<8x128xf32> to vector<1x8x128xf32>
    tpu.vector_store %arg5[%c1_16, %c0_17, %c0_18], %29 {strides = array<i32>} : memref<2x8x128xf32, #tpu.memory_space<vmem>>, vector<1x8x128xf32>,
    %c0_i32_19 = arith.constant 0 : i32
    %30 = arith.cmpi eq, %arg1, %c0_i32_19 : i32
    %31 = arith.extui %30 : i1 to i32
    %c0_i32_20 = arith.constant 0 : i32
    %32 = arith.cmpi ne, %31, %c0_i32_20 : i32
    scf.if %32 {
      %c0_21 = arith.constant 0 : index
      %c0_22 = arith.constant 0 : index
      %c0_23 = arith.constant 0 : index
      %33 = vector.load %arg5[%c0_21, %c0_22, %c0_23] : memref<2x8x128xf32, #tpu.memory_space<vmem>>, vector<2x8x128xf32>
      %c0_24 = arith.constant 0 : index
      %c0_25 = arith.constant 0 : index
      %c0_26 = arith.constant 0 : index
      %c0_27 = arith.constant 0 : index
      %34 = vector.load %arg4[%c0_24, %c0_25, %c0_26, %c0_27] : memref<1x2x8x128xf32, #tpu.memory_space<vmem>>, vector<1x2x8x128xf32>
      %35 = vector.shape_cast %34 : vector<1x2x8x128xf32> to vector<2x8x128xf32>
      %36 = vector.shape_cast %33 : vector<2x8x128xf32> to vector<1x2x8x128xf32>
      tpu.vector_store %arg4[%c0_24, %c0_25, %c0_26, %c0_27], %36 {strides = array<i32>} : memref<1x2x8x128xf32, #tpu.memory_space<vmem>>, vector<1x2x8x128xf32>,
    } else {
    }
    return
  }
  func.func @transform_0(%arg0: i32, %arg1: i32) -> (i32, i32) {
    %c1_i32 = arith.constant 1 : i32
    %0 = arith.muli %arg0, %c1_i32 : i32
    %1 = arith.addi %0, %arg1 : i32
    %c0_i32 = arith.constant 0 : i32
    %c0_i32_0 = arith.constant 0 : i32
    return %1, %c0_i32 : i32, i32
  }
  func.func @transform_1(%arg0: i32, %arg1: i32) -> (i32, i32) {
    %c1_i32 = arith.constant 1 : i32
    %0 = arith.muli %arg0, %c1_i32 : i32
    %1 = arith.addi %0, %arg1 : i32
    %c0_i32 = arith.constant 0 : i32
    %c0_i32_0 = arith.constant 0 : i32
    return %1, %c0_i32 : i32, i32
  }
  func.func @transform_2(%arg0: i32, %arg1: i32) -> (i32, i32, i32, i32) {
    %c0_i32 = arith.constant 0 : i32
    %c0_i32_0 = arith.constant 0 : i32
    %c0_i32_1 = arith.constant 0 : i32
    %c0_i32_2 = arith.constant 0 : i32
    return %arg0, %c0_i32, %c0_i32_0, %c0_i32_1 : i32, i32, i32, i32
  }
}

</mosaic_0001>

<bundles_post_ra>
// kernel: tpu_custom_call.1
= control target key start
LH: loop header
LB: loop body
LE: loop exit
PB: predicated region body
PF: predicated region fallthrough
CT: control target
= control target key end

     0   :  { %7 = vsyncpa [#allocation4], 0  ;;  %s254_s0 = inlined_call_operand.hbm [shape: f32[16,128], index: 0, kind: input, shape index: {}]   ;;  %s255_s1 = inlined_call_operand.hbm [shape: f32[16,128], index: 1, kind: input, shape index: {}]   ;;  %s256_s2 = inlined_call_operand.hbm [shape: f32[1,2,8,128], index: 2, kind: output, shape index: {}]  }
   0x1   :  { %8 = vsyncpa [#allocation7], 0 }
   0x2   :  { %9 = vsyncpa [#allocation5], 0  ;;  %s189_s9 = smov [#allocation3]   ;;  %s117_s13 = scalar_lea.hbm %s254_s0, 256 }
   0x3   :  { %s19_s10 = sshll.u32 %s189_s9, 4  ;;  %p118_p0 = scmp.ne.s32.totalorder %s254_s0, %s117_s13  ;;  %s20_s10 = int_to_ptr.vmem [resolvable:$true] %s19_s10 }
   0x4   :  { %p121_p1 = scmp.lt.u32.totalorder %s117_s13, %s254_s0 }
   0x6   :  { %p123_p2 = pnand %p121_p1, %p118_p0 }
   0x8   :  { %126 = shalt.err (!%p123_p2)
}
   0x9   :  { %s127_s18 = scalar_lea.vmem %s20_s10, 256  ;;  %p132_p4 = scmp.lt.s32.totalorder %s20_s10, %s20_s10 }
   0xa   :  { %p128_p3 = scmp.ne.s32.totalorder %s20_s10, %s127_s18  ;;  %p133_p5 = scmp.lt.s32.totalorder %s127_s18, %s127_s18 }
   0xc   :  { %p134_p6 = por %p133_p5, %p132_p4 }
   0xe   :  { %p135_p7 = pnand %p134_p6, %p128_p3 }
  0x10   :  { %138 = shalt.err (!%p135_p7)
}
  0x11   :  { %s190_s19 = smov 128   ;;  %s191_s20 = smov 8  }
  0x12   :  { %25 = dma.hbm_to_vmem [thread:$0]  %s254_s0, 256, %s20_s10, [#allocation4], %s190_s19, %s190_s19, %s191_s20  }
  0x13   :  { %s192_s23 = smov [#allocation6]   ;;  %s139_s27 = scalar_lea.hbm %s255_s1, 256 }
  0x14   :  { %s35_s24 = sshll.u32 %s192_s23, 4  ;;  %p140_p8 = scmp.ne.s32.totalorder %s255_s1, %s139_s27  ;;  %s36_s24 = int_to_ptr.vmem [resolvable:$true] %s35_s24 }
  0x15   :  { %p143_p9 = scmp.lt.u32.totalorder %s139_s27, %s255_s1 }
  0x17   :  { %p145_p10 = pnand %p143_p9, %p140_p8 }
  0x19   :  { %148 = shalt.err (!%p145_p10)
}
  0x1a   :  { %s149_s4 = scalar_lea.vmem %s36_s24, 256  ;;  %p154_p12 = scmp.lt.s32.totalorder %s36_s24, %s36_s24 }
  0x1b   :  { %p150_p11 = scmp.ne.s32.totalorder %s36_s24, %s149_s4  ;;  %p155_p13 = scmp.lt.s32.totalorder %s149_s4, %s149_s4 }
  0x1d   :  { %p156_p0 = por %p155_p13, %p154_p12 }
  0x1f   :  { %p157_p1 = pnand %p156_p0, %p150_p11 }
  0x21   :  { %160 = shalt.err (!%p157_p1)
}
  0x22   :  { %41 = dma.hbm_to_vmem [thread:$0]  %s255_s1, 256, %s36_s24, [#allocation7], %s190_s19, %s190_s19, %s191_s20  }
  0x23   :  { %183 = dma.done.wait [#allocation4], 256  }
  0x24   :  { %184 = vsyncadd [#allocation4], 4294967040 }
  0x25   :  { %185 = dma.done.wait [#allocation7], 256  }
  0x26   :  { %186 = vsyncadd [#allocation7], 4294967040  ;;  %v58_v0 = vld [vmem:[#allocation3] sm:$0xff]  ;;  %v59_v1 = vld [vmem:[#allocation3 + $0x8] sm:$0xff]  ;;  %s193_s1 = smov [#allocation8]  }
  0x27   :  { %v62_v2 = vmul.f32 0.5, %v58_v0  ;;  %v63_v3 = vmul.f32 0.5, %v59_v1  ;;  %v60_v7 = vld [vmem:[#allocation6] sm:$0xff]  ;;  %v61_v9 = vld [vmem:[#allocation6 + $0x8] sm:$0xff]  ;;  %s95_s6 = sshll.u32 %s193_s1, 4  ;;  %s96_s6 = int_to_ptr.vmem [resolvable:$true] %s95_s6 }
  0x28   :  { %s161_s7 = scalar_lea.vmem %s96_s6, 256  ;;  %p166_p3 = scmp.lt.s32.totalorder %s96_s6, %s96_s6 }
  0x29   :  { %113 = vtanh.f32 %v62_v2  ;;  %p162_p2 = scmp.ne.s32.totalorder %s96_s6, %s161_s7  ;;  %p167_p4 = scmp.lt.s32.totalorder %s161_s7, %s161_s7 }
  0x2a   :  { %115 = vtanh.f32 %v63_v3 }
  0x2b   :  { %p168_p5 = por %p167_p4, %p166_p3 }
  0x2d   :  { %p169_p6 = pnand %p168_p5, %p162_p2 }
  0x33   :  { %v114_v4 = vpop.eup %113 }
  0x34   :  { %v116_v5 = vpop.eup %115  ;;  %v66_v6 = vmul.f32 0.5, %v114_v4 }
  0x35   :  { %v67_v8 = vmul.f32 0.5, %v116_v5 }
  0x36   :  { %v68_v10 = vadd.f32 0.5, %v66_v6 }
  0x37   :  { %v69_v11 = vadd.f32 0.5, %v67_v8 }
  0x38   :  { %v70_v12 = vmul.f32 %v68_v10, %v60_v7  ;;  %v72_v13 = vadd.f32 %v68_v10, %v60_v7 }
  0x39   :  { %v71_v14 = vmul.f32 %v69_v11, %v61_v9  ;;  %v73_v15 = vadd.f32 %v69_v11, %v61_v9 }
  0x3b   :  { %v75_v16 = vadd.f32 %v71_v14, %v70_v12  ;;  %v80_v17 = vadd.f32 %v73_v15, %v72_v13 }
  0x3d   :  { %88 = vst [vmem:[#allocation8] sm:$0xff] %v75_v16  ;;  %89 = vst [vmem:[#allocation8 + $0x8] sm:$0xff] %v80_v17 }
  0x3e   :  { %172 = shalt.err (!%p169_p6)
}
  0x3f   :  { %s173_s10 = scalar_lea.hbm %s256_s2, 256 }
  0x40   :  { %p174_p7 = scmp.ne.s32.totalorder %s256_s2, %s173_s10  ;;  %p177_p8 = scmp.lt.u32.totalorder %s173_s10, %s256_s2 }
  0x42   :  { %p179_p9 = pnand %p177_p8, %p174_p7 }
  0x44   :  { %182 = shalt.err (!%p179_p9)
}
  0x45   :  { %101 = dma.vmem_to_hbm [thread:$0]  %s96_s6, 256, %s256_s2, [#allocation5], %s190_s19, %s190_s19, %s191_s20  }
  0x46   :  { %187 = dma.done.wait [#allocation5], 256  }
  0x47   :  { %188 = vsyncadd [#allocation5], 4294967040 }
  0x48   :  { %105 = vsyncpa [#allocation4], 1 }
  0x49   :  { %106 = vsyncpa [#allocation7], 1 }
  0x4a   :  { %107 = vsyncpa [#allocation5], 1 }

</bundles_post_ra>
